<compile_context>
chip_gen: v5e
topology: v5e:2x2
jax: 0.10.0
libtpu: 0.0.40
codegen_flags: <defaults>
</compile_context>

<pallas_src>
import jax
import jax.numpy as jnp
from jax.experimental import pallas as pl
from jax.experimental.pallas import tpu as pltpu

BN_EPS = 1e-5
_LANE = 128
_SUBLANE = 16  # min 8 for f32 tiles; 16 also keeps bf16-tiled refs legal


def _round_up(n, m):
    return ((n + m - 1) // m) * m


# --------------------------------------------------------------------------
# Kernels
# --------------------------------------------------------------------------
def _make_resident_kernel(n_layers):
    """All layers unrolled, full weight stack VMEM-resident."""

    def kernel(x_ref, w_ref, b_ref, alpha_ref, scale_ref, shift_ref, o_ref):
        act = x_ref[...]                                        # (tb, dp_in) f32
        for l in range(n_layers):                               # static unroll
            kl = act.shape[1]                                   # static K extent
            z = jnp.dot(act.astype(jnp.bfloat16),               # bf16 MXU inputs
                        w_ref[l, :kl, :],                       # (kl, dp) bf16
                        preferred_element_type=jnp.float32)     # f32 accumulate
            z = z + b_ref[l]                                    # (1, dp) f32
            act = jnp.where(z > 0.0, z, alpha_ref[l] * z)       # PReLU (f32 VPU)
        # Only the last layer's BN is explicit; earlier BNs were folded into
        # the next layer's weights/bias at trace time.
        o_ref[...] = (act * scale_ref[...] + shift_ref[...]).astype(o_ref.dtype)

    return kernel


def _make_streaming_kernel(dp_in, dp):
    """Layer axis in the grid; weights streamed, activation kept in VMEM scratch."""

    def kernel(x_ref, w_ref, b_ref, alpha_ref, scale_ref, shift_ref, o_ref,
               act_ref):
        l = pl.program_id(1)
        n_layers = pl.num_programs(1)

        @pl.when(l == 0)
        def _():
            act_ref[...] = jnp.zeros_like(act_ref)
            act_ref[:, :dp_in] = x_ref[...]

        z = jnp.dot(act_ref[...].astype(jnp.bfloat16),          # (tb, dk) bf16
                    w_ref[0],                                   # (dk, dp) bf16
                    preferred_element_type=jnp.float32)
        z = z + b_ref[0]                                        # (1, dp) f32
        y = jnp.where(z > 0.0, z, alpha_ref[l] * z)             # PReLU

        @pl.when(l < n_layers - 1)
        def _():
            act_ref[:, :dp] = y                                 # carry to next layer

        @pl.when(l == n_layers - 1)
        def _():
            o_ref[...] = (y * scale_ref[...] + shift_ref[...]).astype(o_ref.dtype)

    return kernel


# --------------------------------------------------------------------------
# Trace-time parameter packing (BN folding + bf16 weights + zero padding)
# --------------------------------------------------------------------------
def _pack_params(params, dp_in, dp, dk):
    n_layers = len(params)
    w_s = jnp.zeros((n_layers, dk, dp), jnp.float32)
    b_s = jnp.zeros((n_layers, 1, dp), jnp.float32)   # pad MUST stay 0
    alpha_s = jnp.zeros((n_layers,), jnp.float32)

    prev_scale = None
    prev_shift = None
    for l, p in enumerate(params):
        din, dout = p["w"].shape
        w = p["w"].astype(jnp.float32)
        b = p["b"].reshape(-1).astype(jnp.float32)
        if prev_scale is not None:
            # Fold the previous layer's BatchNorm into this layer's Linear:
            #   W' = diag(scale_{l-1}) @ W_l,  b' = shift_{l-1} @ W_l + b_l
            b = prev_shift @ p["w"].astype(jnp.float32) + b
            w = prev_scale[:, None] * w
        scale = (p["gamma"].reshape(-1).astype(jnp.float32)
                 * jax.lax.rsqrt(p["var"].reshape(-1).astype(jnp.float32) + BN_EPS))
        shift = p["beta"].reshape(-1).astype(jnp.float32) \
            - p["mean"].reshape(-1).astype(jnp.float32) * scale
        w_s = w_s.at[l, :din, :dout].set(w)
        b_s = b_s.at[l, 0, :dout].set(b)
        alpha_s = alpha_s.at[l].set(jnp.reshape(p["alpha"], ()).astype(jnp.float32))
        prev_scale, prev_shift = scale, shift

    # Explicit BN only for the last layer.
    dout_last = params[-1]["w"].shape[1]
    scale_last = jnp.ones((1, dp), jnp.float32).at[0, :dout_last].set(prev_scale)
    shift_last = jnp.zeros((1, dp), jnp.float32).at[0, :dout_last].set(prev_shift)

    # bf16 weights feed the MXU at full rate (v6e/v7x); accumulation is f32.
    return w_s.astype(jnp.bfloat16), b_s, alpha_s, scale_last, shift_last


# --------------------------------------------------------------------------
# Wrapper
# --------------------------------------------------------------------------
def _grid_const_spec(block_shape, index_map, single_buffer):
    """BlockSpec for grid-invariant params: single-buffer when supported."""
    if single_buffer:
        try:
            return pl.BlockSpec(block_shape, index_map,
                                pipeline_mode=pl.Buffered(1))
        except (TypeError, AttributeError):
            pass
    return pl.BlockSpec(block_shape, index_map)


def encoder_forward(x, params, *, max_batch_tile=512, force_stream=False):
    batch, in_dim = x.shape
    n_layers = len(params)
    out_dim = params[-1]["w"].shape[1]

    # Padded feature widths (lane-dense). Layer 0's K extent is padded only to
    # its own 128-multiple, not to the hidden width.
    dp_in = _round_up(in_dim, _LANE)
    dp = max(_round_up(p["w"].shape[1], _LANE) for p in params)
    dk = max(dp_in, dp)                     # K extent of the packed weight slab

    # ---- batch tile selection ---------------------------------------------
    if batch <= max_batch_tile:
        tb = _round_up(batch, _SUBLANE)
        # Give v7x's two TensorCores separate tiles when it doesn't inflate
        # padding (harmless on single-TC v5e/v6e).
        if batch >= 2 * _SUBLANE:
            tb_half = _round_up((batch + 1) // 2, _SUBLANE)
            if 2 * tb_half <= tb + _SUBLANE:
                tb = tb_half
    else:
        # Multiples of 256 (v6e/v7x MXU M-extent, 2x128 on v5e); pick the
        # candidate minimizing batch padding, tie-break larger tile.
        step = 256
        candidates = list(range(step, max_batch_tile + 1, step)) or \
            [max(_SUBLANE, (max_batch_tile // _SUBLANE) * _SUBLANE)]
        tb = min(candidates, key=lambda t: (_round_up(batch, t), -t))
    bp = _round_up(batch, tb)

    # ---- packed params / padded input ---------------------------------------
    w_s, b_s, alpha_s, scale_last, shift_last = _pack_params(params, dp_in, dp, dk)
    x_pad = jnp.zeros((bp, dp_in), jnp.float32).at[:batch, :in_dim].set(
        x.astype(jnp.float32))

    # ---- generation-aware VMEM budget ---------------------------------------
    try:
        vmem_cap = int(pltpu.get_tpu_info().vmem_capacity_bytes)
    except Exception:  # interpret mode / older API: assume the smallest (v7x)
        vmem_cap = 64 * 1024 * 1024
    vmem_cap_usable = int(vmem_cap * 0.8)   # headroom for compiler scratch/sems

    w_bytes = n_layers * dk * dp * 2                       # bf16 weights (1 buf)
    vec_bytes = (n_layers + 2) * 8 * dp * 4                # bias + scale/shift
    io_bytes = 2 * tb * dp_in * 4 + 2 * tb * dp * 4        # double-buffered x/out
    act_bytes = 2 * tb * dp * 4                            # in-flight activations
    resident_est = w_bytes + vec_bytes + io_bytes + act_bytes

    use_stream = force_stream or (resident_est > vmem_cap_usable)

    def _vmem_limit(est):
        if est <= 8 * 1024 * 1024:
            return None                      # default scoped limit is enough
        return min(vmem_cap_usable, max(int(1.5 * est), 32 * 1024 * 1024))

    # ---- resident-weights path ----------------------------------------------
    def _run_resident(single_buffer):
        est = resident_est + (0 if single_buffer else w_bytes)
        kernel = _make_resident_kernel(n_layers)
        return pl.pallas_call(
            kernel,
            out_shape=jax.ShapeDtypeStruct((bp, dp), jnp.float32),
            grid=(bp // tb,),
            in_specs=[
                pl.BlockSpec((tb, dp_in), lambda i: (i, 0)),                  # x tile
                _grid_const_spec((n_layers, dk, dp), lambda i: (0, 0, 0),
                                 single_buffer),                              # weights
                _grid_const_spec((n_layers, 1, dp), lambda i: (0, 0, 0),
                                 single_buffer),                              # bias
                pl.BlockSpec(memory_space=pltpu.SMEM),                        # alphas
                _grid_const_spec((1, dp), lambda i: (0, 0), single_buffer),   # BN scale
                _grid_const_spec((1, dp), lambda i: (0, 0), single_buffer),   # BN shift
            ],
            out_specs=pl.BlockSpec((tb, dp), lambda i: (i, 0)),
            compiler_params=pltpu.CompilerParams(
                dimension_semantics=("parallel",),
                vmem_limit_bytes=_vmem_limit(est),
            ),
        )(x_pad, w_s, b_s, alpha_s, scale_last, shift_last)

    # ---- layer-streaming path (v7x-sized weight stacks) ---------------------
    def _run_streaming():
        est = (2 * dk * dp * 2                     # double-buffered layer weight
               + 3 * 2 * 8 * dp * 4                # bias / scale / shift blocks
               + tb * dk * 4                       # activation scratch
               + io_bytes)
        kernel = _make_streaming_kernel(dp_in, dp)
        return pl.pallas_call(
            kernel,
            out_shape=jax.ShapeDtypeStruct((bp, dp), jnp.float32),
            grid=(bp // tb, n_layers),
            in_specs=[
                pl.BlockSpec((tb, dp_in), lambda i, l: (i, 0)),      # x tile
                pl.BlockSpec((1, dk, dp), lambda i, l: (l, 0, 0)),   # layer weight
                pl.BlockSpec((1, 1, dp), lambda i, l: (l, 0, 0)),    # layer bias
                pl.BlockSpec(memory_space=pltpu.SMEM),               # alphas
                pl.BlockSpec((1, dp), lambda i, l: (0, 0)),          # last BN scale
                pl.BlockSpec((1, dp), lambda i, l: (0, 0)),          # last BN shift
            ],
            out_specs=pl.BlockSpec((tb, dp), lambda i, l: (i, 0)),
            scratch_shapes=[pltpu.VMEM((tb, dk), jnp.float32)],      # carried act
            compiler_params=pltpu.CompilerParams(
                dimension_semantics=("parallel", "arbitrary"),
                vmem_limit_bytes=_vmem_limit(est),
            ),
        )(x_pad, w_s, b_s, alpha_s, scale_last, shift_last)

    if use_stream:
        out = _run_streaming()
    else:
        try:
            out = _run_resident(single_buffer=True)
        except Exception:
            # pipeline_mode=pl.Buffered(1) unsupported on this jax version:
            # fall back to default double-buffering of the resident params.
            out = _run_resident(single_buffer=False)

    return out[:batch, :out_dim]


# --------------------------------------------------------------------------
# Synthetic parameters + pure-JAX reference
# --------------------------------------------------------------------------
def init_encoder_params(key, context_dim, encoder_units, n_encoder_layers):
    """Deterministic synthetic parameters, shapes matching the PyTorch module."""
    params = []
    in_units = context_dim
    for _ in range(n_encoder_layers):
        key, kw, kb, km, kv, kg, kbt = jax.random.split(key, 7)
        scale = 1.0 / jnp.sqrt(jnp.float32(in_units))
        p = dict(
            w=jax.random.uniform(kw, (in_units, encoder_units), jnp.float32,
                                 -scale, scale),
            b=jax.random.uniform(kb, (1, encoder_units), jnp.float32,
                                 -scale, scale),
            alpha=jnp.float32(0.25),                           # PReLU default
            mean=0.1 * jax.random.normal(km, (1, encoder_units), jnp.float32),
            var=1.0 + 0.1 * jax.random.uniform(kv, (1, encoder_units),
                                               jnp.float32),
            gamma=1.0 + 0.05 * jax.random.normal(kg, (1, encoder_units),
                                                 jnp.float32),
            beta=0.05 * jax.random.normal(kbt, (1, encoder_units), jnp.float32),
        )
        params.append(p)
        in_units = encoder_units
    return params


def encoder_forward_ref(x, params):
    """Pure-JAX f32 reference (un-fused, un-padded) for correctness checking."""
    for p in params:
        z = x @ p["w"] + p["b"]
        y = jnp.where(z > 0, z, p["alpha"] * z)
        x = (y - p["mean"]) * jax.lax.rsqrt(p["var"] + BN_EPS) * p["gamma"] \
            + p["beta"]
    return x


if __name__ == "__main__":
    key = jax.random.PRNGKey(0)

    def check(context_dim, encoder_units, n_layers, batch, force_stream, key):
        key, kx, kp = jax.random.split(key, 3)
        x = jax.random.normal(kx, (batch, context_dim), jnp.float32)
        params = init_encoder_params(kp, context_dim, encoder_units, n_layers)
        out = jax.block_until_ready(
            encoder_forward(x, params, force_stream=force_stream))
        ref = encoder_forward_ref(x, params)
        assert out.shape == (batch, encoder_units), out.shape
        # bf16 MXU inputs -> tolerance relaxed vs the f32 reference.
        err = float(jnp.max(jnp.abs(out - ref)))
        assert jnp.allclose(out, ref, atol=5e-2, rtol=5e-2), err
        return key

    # Resident-weights path (module's natural small shapes).
    key = check(16, 32, 3, 8, False, key)
    # Layer-streaming path (forced; same semantics).
    key = check(16, 32, 3, 8, True, key)
    # dp_in != dp (layer-0 K slicing) and non-multiple batch, both paths.
    key = check(16, 200, 2, 20, False, key)
    key = check(16, 200, 2, 20, True, key)

    print("KERNEL_OK")
</pallas_src>

<mosaic_0001>
module attributes {stable_mosaic.version = 11 : i64} {
  func.func @kernel(%arg0: i32, %arg1: memref<16x128xf32, #tpu.memory_space<vmem>>, %arg2: memref<3x128x128xbf16, #tpu.memory_space<vmem>>, %arg3: memref<3x1x128xf32, #tpu.memory_space<vmem>>, %arg4: memref<3xf32, #tpu.memory_space<smem>>, %arg5: memref<1x128xf32, #tpu.memory_space<vmem>>, %arg6: memref<1x128xf32, #tpu.memory_space<vmem>>, %arg7: memref<16x128xf32, #tpu.memory_space<vmem>>) attributes {dimension_semantics = [#tpu.dimension_semantics<parallel>], iteration_bounds = array<i64: 1>, scalar_prefetch = 0 : i64, scratch_operands = 0 : i64, tpu.core_type = #tpu.core_type<tc>, window_params = [{transform_indices = @transform_0, window_bounds = array<i64: 16, 128>}, {pipeline_mode = #tpu.pipeline_mode<synchronous>, transform_indices = @transform_1, window_bounds = array<i64: 3, 128, 128>}, {pipeline_mode = #tpu.pipeline_mode<synchronous>, transform_indices = @transform_2, window_bounds = array<i64: 3, 1, 128>}, {transform_indices = @transform_3, window_bounds = array<i64: 3>}, {pipeline_mode = #tpu.pipeline_mode<synchronous>, transform_indices = @transform_4, window_bounds = array<i64: 1, 128>}, {pipeline_mode = #tpu.pipeline_mode<synchronous>, transform_indices = @transform_5, window_bounds = array<i64: 1, 128>}, {transform_indices = @transform_6, window_bounds = array<i64: 16, 128>}]} {
    %c0 = arith.constant 0 : index
    %c0_0 = arith.constant 0 : index
    %0 = vector.load %arg1[%c0, %c0_0] : memref<16x128xf32, #tpu.memory_space<vmem>>, vector<16x128xf32>
    %1 = arith.truncf %0 : vector<16x128xf32> to vector<16x128xbf16>
    %c0_1 = arith.constant 0 : index
    %c0_2 = arith.constant 0 : index
    %c0_3 = arith.constant 0 : index
    %2 = vector.load %arg2[%c0_1, %c0_2, %c0_3] : memref<3x128x128xbf16, #tpu.memory_space<vmem>>, vector<1x128x128xbf16>
    %3 = vector.shape_cast %2 : vector<1x128x128xbf16> to vector<128x128xbf16>
    %cst = arith.constant dense<0.000000e+00> : vector<16x128xf32>
    %4 = tpu.matmul %1, %3, %cst {dimension_numbers = #tpu.dot_dimension_numbers<[1], [0], [0], [1], [0, 0, 1, 1], [], []>} : vector<16x128xbf16>, vector<128x128xbf16>, vector<16x128xf32> -> vector<16x128xf32>
    %c0_4 = arith.constant 0 : index
    %c0_5 = arith.constant 0 : index
    %c0_6 = arith.constant 0 : index
    %5 = vector.load %arg3[%c0_4, %c0_5, %c0_6] : memref<3x1x128xf32, #tpu.memory_space<vmem>>, vector<1x1x128xf32>
    %6 = vector.shape_cast %5 : vector<1x1x128xf32> to vector<1x128xf32>
    %7 = vector.broadcast %6 : vector<1x128xf32> to vector<16x128xf32>
    %8 = arith.addf %4, %7 : vector<16x128xf32>
    %cst_7 = arith.constant 0.000000e+00 : f32
    %9 = vector.broadcast %cst_7 : f32 to vector<16x128xf32>
    %10 = arith.cmpf ogt, %8, %9 : vector<16x128xf32>
    %c0_8 = arith.constant 0 : index
    %11 = memref.load %arg4[%c0_8] : memref<3xf32, #tpu.memory_space<smem>>
    %12 = vector.broadcast %11 : f32 to vector<16x128xf32>
    %13 = arith.mulf %12, %8 : vector<16x128xf32>
    %14 = arith.select %10, %8, %13 : vector<16x128xi1>, vector<16x128xf32>
    %15 = arith.truncf %14 : vector<16x128xf32> to vector<16x128xbf16>
    %c1 = arith.constant 1 : index
    %c0_9 = arith.constant 0 : index
    %c0_10 = arith.constant 0 : index
    %16 = vector.load %arg2[%c1, %c0_9, %c0_10] : memref<3x128x128xbf16, #tpu.memory_space<vmem>>, vector<1x128x128xbf16>
    %17 = vector.shape_cast %16 : vector<1x128x128xbf16> to vector<128x128xbf16>
    %cst_11 = arith.constant dense<0.000000e+00> : vector<16x128xf32>
    %18 = tpu.matmul %15, %17, %cst_11 {dimension_numbers = #tpu.dot_dimension_numbers<[1], [0], [0], [1], [0, 0, 1, 1], [], []>} : vector<16x128xbf16>, vector<128x128xbf16>, vector<16x128xf32> -> vector<16x128xf32>
    %c1_12 = arith.constant 1 : index
    %c0_13 = arith.constant 0 : index
    %c0_14 = arith.constant 0 : index
    %19 = vector.load %arg3[%c1_12, %c0_13, %c0_14] : memref<3x1x128xf32, #tpu.memory_space<vmem>>, vector<1x1x128xf32>
    %20 = vector.shape_cast %19 : vector<1x1x128xf32> to vector<1x128xf32>
    %21 = vector.broadcast %20 : vector<1x128xf32> to vector<16x128xf32>
    %22 = arith.addf %18, %21 : vector<16x128xf32>
    %cst_15 = arith.constant 0.000000e+00 : f32
    %23 = vector.broadcast %cst_15 : f32 to vector<16x128xf32>
    %24 = arith.cmpf ogt, %22, %23 : vector<16x128xf32>
    %c1_16 = arith.constant 1 : index
    %25 = memref.load %arg4[%c1_16] : memref<3xf32, #tpu.memory_space<smem>>
    %26 = vector.broadcast %25 : f32 to vector<16x128xf32>
    %27 = arith.mulf %26, %22 : vector<16x128xf32>
    %28 = arith.select %24, %22, %27 : vector<16x128xi1>, vector<16x128xf32>
    %29 = arith.truncf %28 : vector<16x128xf32> to vector<16x128xbf16>
    %c2 = arith.constant 2 : index
    %c0_17 = arith.constant 0 : index
    %c0_18 = arith.constant 0 : index
    %30 = vector.load %arg2[%c2, %c0_17, %c0_18] : memref<3x128x128xbf16, #tpu.memory_space<vmem>>, vector<1x128x128xbf16>
    %31 = vector.shape_cast %30 : vector<1x128x128xbf16> to vector<128x128xbf16>
    %cst_19 = arith.constant dense<0.000000e+00> : vector<16x128xf32>
    %32 = tpu.matmul %29, %31, %cst_19 {dimension_numbers = #tpu.dot_dimension_numbers<[1], [0], [0], [1], [0, 0, 1, 1], [], []>} : vector<16x128xbf16>, vector<128x128xbf16>, vector<16x128xf32> -> vector<16x128xf32>
    %c2_20 = arith.constant 2 : index
    %c0_21 = arith.constant 0 : index
    %c0_22 = arith.constant 0 : index
    %33 = vector.load %arg3[%c2_20, %c0_21, %c0_22] : memref<3x1x128xf32, #tpu.memory_space<vmem>>, vector<1x1x128xf32>
    %34 = vector.shape_cast %33 : vector<1x1x128xf32> to vector<1x128xf32>
    %35 = vector.broadcast %34 : vector<1x128xf32> to vector<16x128xf32>
    %36 = arith.addf %32, %35 : vector<16x128xf32>
    %cst_23 = arith.constant 0.000000e+00 : f32
    %37 = vector.broadcast %cst_23 : f32 to vector<16x128xf32>
    %38 = arith.cmpf ogt, %36, %37 : vector<16x128xf32>
    %c2_24 = arith.constant 2 : index
    %39 = memref.load %arg4[%c2_24] : memref<3xf32, #tpu.memory_space<smem>>
    %40 = vector.broadcast %39 : f32 to vector<16x128xf32>
    %41 = arith.mulf %40, %36 : vector<16x128xf32>
    %42 = arith.select %38, %36, %41 : vector<16x128xi1>, vector<16x128xf32>
    %c0_25 = arith.constant 0 : index
    %c0_26 = arith.constant 0 : index
    %43 = vector.load %arg5[%c0_25, %c0_26] : memref<1x128xf32, #tpu.memory_space<vmem>>, vector<1x128xf32>
    %44 = vector.broadcast %43 : vector<1x128xf32> to vector<16x128xf32>
    %45 = arith.mulf %42, %44 : vector<16x128xf32>
    %c0_27 = arith.constant 0 : index
    %c0_28 = arith.constant 0 : index
    %46 = vector.load %arg6[%c0_27, %c0_28] : memref<1x128xf32, #tpu.memory_space<vmem>>, vector<1x128xf32>
    %47 = vector.broadcast %46 : vector<1x128xf32> to vector<16x128xf32>
    %48 = arith.addf %45, %47 : vector<16x128xf32>
    %c0_29 = arith.constant 0 : index
    %c0_30 = arith.constant 0 : index
    %49 = vector.load %arg7[%c0_29, %c0_30] : memref<16x128xf32, #tpu.memory_space<vmem>>, vector<16x128xf32>
    tpu.vector_store %arg7[%c0_29, %c0_30], %48 {strides = array<i32>} : memref<16x128xf32, #tpu.memory_space<vmem>>, vector<16x128xf32>,
    return
  }
  func.func @transform_0(%arg0: i32) -> (i32, i32) {
    %c0_i32 = arith.constant 0 : i32
    %c0_i32_0 = arith.constant 0 : i32
    return %arg0, %c0_i32 : i32, i32
  }
  func.func @transform_1(%arg0: i32) -> (i32, i32, i32) {
    %c0_i32 = arith.constant 0 : i32
    %c0_i32_0 = arith.constant 0 : i32
    %c0_i32_1 = arith.constant 0 : i32
    %c0_i32_2 = arith.constant 0 : i32
    return %c0_i32, %c0_i32_0, %c0_i32_1 : i32, i32, i32
  }
  func.func @transform_2(%arg0: i32) -> (i32, i32, i32) {
    %c0_i32 = arith.constant 0 : i32
    %c0_i32_0 = arith.constant 0 : i32
    %c0_i32_1 = arith.constant 0 : i32
    %c0_i32_2 = arith.constant 0 : i32
    return %c0_i32, %c0_i32_0, %c0_i32_1 : i32, i32, i32
  }
  func.func @transform_3(%arg0: i32) -> i32 {
    %c0_i32 = arith.constant 0 : i32
    %c0_i32_0 = arith.constant 0 : i32
    return %c0_i32 : i32
  }
  func.func @transform_4(%arg0: i32) -> (i32, i32) {
    %c0_i32 = arith.constant 0 : i32
    %c0_i32_0 = arith.constant 0 : i32
    %c0_i32_1 = arith.constant 0 : i32
    return %c0_i32, %c0_i32_0 : i32, i32
  }
  func.func @transform_5(%arg0: i32) -> (i32, i32) {
    %c0_i32 = arith.constant 0 : i32
    %c0_i32_0 = arith.constant 0 : i32
    %c0_i32_1 = arith.constant 0 : i32
    return %c0_i32, %c0_i32_0 : i32, i32
  }
  func.func @transform_6(%arg0: i32) -> (i32, i32) {
    %c0_i32 = arith.constant 0 : i32
    %c0_i32_0 = arith.constant 0 : i32
    return %arg0, %c0_i32 : i32, i32
  }
}

module attributes {stable_mosaic.version = 11 : i64} {
  func.func @kernel(%arg0: i32, %arg1: memref<16x128xf32, #tpu.memory_space<vmem>>, %arg2: memref<3x128x128xbf16, #tpu.memory_space<vmem>>, %arg3: memref<3x1x128xf32, #tpu.memory_space<vmem>>, %arg4: memref<3xf32, #tpu.memory_space<smem>>, %arg5: memref<1x128xf32, #tpu.memory_space<vmem>>, %arg6: memref<1x128xf32, #tpu.memory_space<vmem>>, %arg7: memref<16x128xf32, #tpu.memory_space<vmem>>) attributes {dimension_semantics = [#tpu.dimension_semantics<parallel>], iteration_bounds = array<i64: 1>, scalar_prefetch = 0 : i64, scratch_operands = 0 : i64, tpu.core_type = #tpu.core_type<tc>, window_params = [{transform_indices = @transform_0, window_bounds = array<i64: 16, 128>}, {pipeline_mode = #tpu.pipeline_mode<synchronous>, transform_indices = @transform_1, window_bounds = array<i64: 3, 128, 128>}, {pipeline_mode = #tpu.pipeline_mode<synchronous>, transform_indices = @transform_2, window_bounds = array<i64: 3, 1, 128>}, {transform_indices = @transform_3, window_bounds = array<i64: 3>}, {pipeline_mode = #tpu.pipeline_mode<synchronous>, transform_indices = @transform_4, window_bounds = array<i64: 1, 128>}, {pipeline_mode = #tpu.pipeline_mode<synchronous>, transform_indices = @transform_5, window_bounds = array<i64: 1, 128>}, {transform_indices = @transform_6, window_bounds = array<i64: 16, 128>}]} {
    %c0 = arith.constant 0 : index
    %c0_0 = arith.constant 0 : index
    %0 = vector.load %arg1[%c0, %c0_0] : memref<16x128xf32, #tpu.memory_space<vmem>>, vector<16x128xf32>
    %1 = arith.truncf %0 : vector<16x128xf32> to vector<16x128xbf16>
    %c0_1 = arith.constant 0 : index
    %c0_2 = arith.constant 0 : index
    %c0_3 = arith.constant 0 : index
    %2 = vector.load %arg2[%c0_1, %c0_2, %c0_3] : memref<3x128x128xbf16, #tpu.memory_space<vmem>>, vector<1x128x128xbf16>
    %3 = vector.shape_cast %2 : vector<1x128x128xbf16> to vector<128x128xbf16>
    %cst = arith.constant dense<0.000000e+00> : vector<16x128xf32>
    %4 = tpu.matmul %1, %3, %cst {dimension_numbers = #tpu.dot_dimension_numbers<[1], [0], [0], [1], [0, 0, 1, 1], [], []>} : vector<16x128xbf16>, vector<128x128xbf16>, vector<16x128xf32> -> vector<16x128xf32>
    %c0_4 = arith.constant 0 : index
    %c0_5 = arith.constant 0 : index
    %c0_6 = arith.constant 0 : index
    %5 = vector.load %arg3[%c0_4, %c0_5, %c0_6] : memref<3x1x128xf32, #tpu.memory_space<vmem>>, vector<1x1x128xf32>
    %6 = vector.shape_cast %5 : vector<1x1x128xf32> to vector<1x128xf32>
    %7 = vector.broadcast %6 : vector<1x128xf32> to vector<16x128xf32>
    %8 = arith.addf %4, %7 : vector<16x128xf32>
    %cst_7 = arith.constant 0.000000e+00 : f32
    %9 = vector.broadcast %cst_7 : f32 to vector<16x128xf32>
    %10 = arith.cmpf ogt, %8, %9 : vector<16x128xf32>
    %c0_8 = arith.constant 0 : index
    %11 = memref.load %arg4[%c0_8] : memref<3xf32, #tpu.memory_space<smem>>
    %12 = vector.broadcast %11 : f32 to vector<16x128xf32>
    %13 = arith.mulf %12, %8 : vector<16x128xf32>
    %14 = arith.select %10, %8, %13 : vector<16x128xi1>, vector<16x128xf32>
    %15 = arith.truncf %14 : vector<16x128xf32> to vector<16x128xbf16>
    %c1 = arith.constant 1 : index
    %c0_9 = arith.constant 0 : index
    %c0_10 = arith.constant 0 : index
    %16 = vector.load %arg2[%c1, %c0_9, %c0_10] : memref<3x128x128xbf16, #tpu.memory_space<vmem>>, vector<1x128x128xbf16>
    %17 = vector.shape_cast %16 : vector<1x128x128xbf16> to vector<128x128xbf16>
    %cst_11 = arith.constant dense<0.000000e+00> : vector<16x128xf32>
    %18 = tpu.matmul %15, %17, %cst_11 {dimension_numbers = #tpu.dot_dimension_numbers<[1], [0], [0], [1], [0, 0, 1, 1], [], []>} : vector<16x128xbf16>, vector<128x128xbf16>, vector<16x128xf32> -> vector<16x128xf32>
    %c1_12 = arith.constant 1 : index
    %c0_13 = arith.constant 0 : index
    %c0_14 = arith.constant 0 : index
    %19 = vector.load %arg3[%c1_12, %c0_13, %c0_14] : memref<3x1x128xf32, #tpu.memory_space<vmem>>, vector<1x1x128xf32>
    %20 = vector.shape_cast %19 : vector<1x1x128xf32> to vector<1x128xf32>
    %21 = vector.broadcast %20 : vector<1x128xf32> to vector<16x128xf32>
    %22 = arith.addf %18, %21 : vector<16x128xf32>
    %cst_15 = arith.constant 0.000000e+00 : f32
    %23 = vector.broadcast %cst_15 : f32 to vector<16x128xf32>
    %24 = arith.cmpf ogt, %22, %23 : vector<16x128xf32>
    %c1_16 = arith.constant 1 : index
    %25 = memref.load %arg4[%c1_16] : memref<3xf32, #tpu.memory_space<smem>>
    %26 = vector.broadcast %25 : f32 to vector<16x128xf32>
    %27 = arith.mulf %26, %22 : vector<16x128xf32>
    %28 = arith.select %24, %22, %27 : vector<16x128xi1>, vector<16x128xf32>
    %29 = arith.truncf %28 : vector<16x128xf32> to vector<16x128xbf16>
    %c2 = arith.constant 2 : index
    %c0_17 = arith.constant 0 : index
    %c0_18 = arith.constant 0 : index
    %30 = vector.load %arg2[%c2, %c0_17, %c0_18] : memref<3x128x128xbf16, #tpu.memory_space<vmem>>, vector<1x128x128xbf16>
    %31 = vector.shape_cast %30 : vector<1x128x128xbf16> to vector<128x128xbf16>
    %cst_19 = arith.constant dense<0.000000e+00> : vector<16x128xf32>
    %32 = tpu.matmul %29, %31, %cst_19 {dimension_numbers = #tpu.dot_dimension_numbers<[1], [0], [0], [1], [0, 0, 1, 1], [], []>} : vector<16x128xbf16>, vector<128x128xbf16>, vector<16x128xf32> -> vector<16x128xf32>
    %c2_20 = arith.constant 2 : index
    %c0_21 = arith.constant 0 : index
    %c0_22 = arith.constant 0 : index
    %33 = vector.load %arg3[%c2_20, %c0_21, %c0_22] : memref<3x1x128xf32, #tpu.memory_space<vmem>>, vector<1x1x128xf32>
    %34 = vector.shape_cast %33 : vector<1x1x128xf32> to vector<1x128xf32>
    %35 = vector.broadcast %34 : vector<1x128xf32> to vector<16x128xf32>
    %36 = arith.addf %32, %35 : vector<16x128xf32>
    %cst_23 = arith.constant 0.000000e+00 : f32
    %37 = vector.broadcast %cst_23 : f32 to vector<16x128xf32>
    %38 = arith.cmpf ogt, %36, %37 : vector<16x128xf32>
    %c2_24 = arith.constant 2 : index
    %39 = memref.load %arg4[%c2_24] : memref<3xf32, #tpu.memory_space<smem>>
    %40 = vector.broadcast %39 : f32 to vector<16x128xf32>
    %41 = arith.mulf %40, %36 : vector<16x128xf32>
    %42 = arith.select %38, %36, %41 : vector<16x128xi1>, vector<16x128xf32>
    %c0_25 = arith.constant 0 : index
    %c0_26 = arith.constant 0 : index
    %43 = vector.load %arg5[%c0_25, %c0_26] : memref<1x128xf32, #tpu.memory_space<vmem>>, vector<1x128xf32>
    %44 = vector.broadcast %43 : vector<1x128xf32> to vector<16x128xf32>
    %45 = arith.mulf %42, %44 : vector<16x128xf32>
    %c0_27 = arith.constant 0 : index
    %c0_28 = arith.constant 0 : index
    %46 = vector.load %arg6[%c0_27, %c0_28] : memref<1x128xf32, #tpu.memory_space<vmem>>, vector<1x128xf32>
    %47 = vector.broadcast %46 : vector<1x128xf32> to vector<16x128xf32>
    %48 = arith.addf %45, %47 : vector<16x128xf32>
    %c0_29 = arith.constant 0 : index
    %c0_30 = arith.constant 0 : index
    %49 = vector.load %arg7[%c0_29, %c0_30] : memref<16x128xf32, #tpu.memory_space<vmem>>, vector<16x128xf32>
    tpu.vector_store %arg7[%c0_29, %c0_30], %48 {strides = array<i32>} : memref<16x128xf32, #tpu.memory_space<vmem>>, vector<16x128xf32>,
    return
  }
  func.func @transform_0(%arg0: i32) -> (i32, i32) {
    %c0_i32 = arith.constant 0 : i32
    %c0_i32_0 = arith.constant 0 : i32
    return %arg0, %c0_i32 : i32, i32
  }
  func.func @transform_1(%arg0: i32) -> (i32, i32, i32) {
    %c0_i32 = arith.constant 0 : i32
    %c0_i32_0 = arith.constant 0 : i32
    %c0_i32_1 = arith.constant 0 : i32
    %c0_i32_2 = arith.constant 0 : i32
    return %c0_i32, %c0_i32_0, %c0_i32_1 : i32, i32, i32
  }
  func.func @transform_2(%arg0: i32) -> (i32, i32, i32) {
    %c0_i32 = arith.constant 0 : i32
    %c0_i32_0 = arith.constant 0 : i32
    %c0_i32_1 = arith.constant 0 : i32
    %c0_i32_2 = arith.constant 0 : i32
    return %c0_i32, %c0_i32_0, %c0_i32_1 : i32, i32, i32
  }
  func.func @transform_3(%arg0: i32) -> i32 {
    %c0_i32 = arith.constant 0 : i32
    %c0_i32_0 = arith.constant 0 : i32
    return %c0_i32 : i32
  }
  func.func @transform_4(%arg0: i32) -> (i32, i32) {
    %c0_i32 = arith.constant 0 : i32
    %c0_i32_0 = arith.constant 0 : i32
    %c0_i32_1 = arith.constant 0 : i32
    return %c0_i32, %c0_i32_0 : i32, i32
  }
  func.func @transform_5(%arg0: i32) -> (i32, i32) {
    %c0_i32 = arith.constant 0 : i32
    %c0_i32_0 = arith.constant 0 : i32
    %c0_i32_1 = arith.constant 0 : i32
    return %c0_i32, %c0_i32_0 : i32, i32
  }
  func.func @transform_6(%arg0: i32) -> (i32, i32) {
    %c0_i32 = arith.constant 0 : i32
    %c0_i32_0 = arith.constant 0 : i32
    return %arg0, %c0_i32 : i32, i32
  }
}

</mosaic_0001>

<bundles_post_ra>
// kernel: tpu_custom_call.1
= control target key start
LH: loop header
LB: loop body
LE: loop exit
PB: predicated region body
PF: predicated region fallthrough
CT: control target
= control target key end

     0   :  { %11 = vsyncpa [#allocation3], 0  ;;  %s725_s0 = inlined_call_operand.hbm [shape: f32[16,128], index: 0, kind: input, shape index: {}]   ;;  %s726_s1 = inlined_call_operand.hbm [shape: bf16[3,128,128], index: 1, kind: input, shape index: {}]   ;;  %s727_s2 = inlined_call_operand.hbm [shape: f32[3,1,128], index: 2, kind: input, shape index: {}]   ;;  %s728_s3 = inlined_call_operand.vmem [shape: f32[3], index: 3, kind: input, shape index: {}]   ;;  %s729_s4 = inlined_call_operand.vmem [shape: f32[1,128], index: 4, kind: input, shape index: {}]   ;;  %s730_s5 = inlined_call_operand.vmem [shape: f32[1,128], index: 5, kind: input, shape index: {}]   ;;  %s731_s6 = inlined_call_operand.hbm [shape: f32[16,128], index: 6, kind: output, shape index: {}]  }
   0x1   :  { %12 = vsyncpa [#allocation7], 0 }
   0x2   :  { %13 = vsyncpa [#allocation5], 0  ;;  %s32_s23 = sshll.u32 %s726_s1, 4  ;;  %s33_s23 = int_to_ptr.hbm [resolvable:$true] %s32_s23 }
   0x3   :  { %14 = vsyncpa [#allocation4], 0  ;;  %s652_s24 = smov [#allocation6]   ;;  %s19_s28 = sshll.u32 %s725_s0, 4  ;;  %s20_s28 = int_to_ptr.hbm [resolvable:$true] %s19_s28 }
   0x4   :  { %s34_s25 = sshll.u32 %s652_s24, 4  ;;  %s653_s29 = smov 64   ;;  %s35_s25 = int_to_ptr.vmem [resolvable:$true] %s34_s25 }
   0x5   :  { %s654_s30 = smov 4   ;;  %s655_s7 = smov [#allocation2]  }
   0x6   :  { %40 = dma.hbm_to_vmem [thread:$0]  %s33_s23, 3072, %s35_s25, [#allocation7], %s653_s29, %s653_s29, %s654_s30  }
   0x7   :  { %s21_s8 = sshll.u32 %s655_s7, 4  ;;  %s656_s9 = smov 128   ;;  %s22_s8 = int_to_ptr.vmem [resolvable:$true] %s21_s8 }
   0x8   :  { %s657_s10 = smov 8   ;;  %s45_s12 = sshll.u32 %s727_s2, 4  ;;  %s46_s12 = int_to_ptr.hbm [resolvable:$true] %s45_s12 }
   0x9   :  { %27 = dma.hbm_to_vmem [thread:$0]  %s20_s28, 256, %s22_s8, [#allocation3], %s656_s9, %s656_s9, %s657_s10  }
   0xa   :  { %s658_s13 = smov [#allocation8]   ;;  %s59_s16 = sshll.u32 %s728_s3, 4  ;;  %s60_s16 = int_to_ptr.vmem [resolvable:$true] %s59_s16 }
   0xb   :  { %s47_s0 = sshll.u32 %s658_s13, 4  ;;  %s659_s17 = smov 16   ;;  %s48_s0 = int_to_ptr.vmem [resolvable:$true] %s47_s0 }
   0xc   :  { %s660_s18 = smov 1   ;;  %s661_s19 = smov [#allocation9]  }
   0xd   :  { %53 = dma.hbm_to_vmem [thread:$0]  %s46_s12, 48, %s48_s0, [#allocation7], %s659_s17, %s659_s17, %s660_s18  }
   0xe   :  { %62 = dma.vmem_to_smem %s60_s16, 16, %s661_s19, [#allocation5]  }
   0xf   :  { %644 = dma.done.wait [#allocation3], 256  }
  0x10   :  { %645 = vsyncadd [#allocation3], 4294967040 }
  0x11   :  { %646 = dma.done.wait [#allocation7], 3120  }
  0x12   :  { %647 = vsyncadd [#allocation7], 4294964176 }
  0x13   :  { %648 = dma.done.wait [#allocation5], 16  }
  0x14   :  { %649 = vsyncadd [#allocation5], 4294967280 }
  0x15   :  { %83 = sfence }
  0x16   :  { %v503_v0 = vld [vmem:[#allocation6 + $0x38] sm:$0xff]  ;;  %v502_v1 = vld [vmem:[#allocation6 + $0x30] sm:$0xff]  ;;  %v501_v4 = vld [vmem:[#allocation6 + $0x28] sm:$0xff]  ;;  %s171_s2 = sld [smem:[#allocation9]]  ;;  %s662_s25 = smov [#allocation10]  }
  0x17   :  { %155 = vmatpush.bf16.msra.mxu0 %v503_v0  ;;  %v511_v2 = vld [vmem:[#allocation6 + $0x78] sm:$0xff]  ;;  %v510_v3 = vld [vmem:[#allocation6 + $0x70] sm:$0xff]  ;;  %v509_v5 = vld [vmem:[#allocation6 + $0x68] sm:$0xff]  ;;  %s462_s3 = sld [smem:[#allocation9 + $0x1]]  ;;  %s381_s26 = sshll.u32 %s662_s25, 4  ;;  %s382_s26 = int_to_ptr.vmem [resolvable:$true] %s381_s26 }
  0x18   :  { %248 = vmatpush.bf16.msra.mxu1 %v511_v2  ;;  %v500_v6 = vld [vmem:[#allocation6 + $0x20] sm:$0xff]  ;;  %v499_v8 = vld [vmem:[#allocation6 + $0x18] sm:$0xff]  ;;  %v498_v9 = vld [vmem:[#allocation6 + $0x10] sm:$0xff]  ;;  %s495_s20 = sld [smem:[#allocation9 + $0x2]] }
  0x19   :  { %v508_v7 = vld [vmem:[#allocation6 + $0x60] sm:$0xff]  ;;  %v497_v10 = vld [vmem:[#allocation6 + $0x8] sm:$0xff]  ;;  %v84_v12 = vld [vmem:[#allocation2] sm:$0xff] }
  0x1a   :  { %v496_v11 = vld [vmem:[#allocation6] sm:$0xff]  ;;  %v85_v13 = vld [vmem:[#allocation2 + $0x8] sm:$0xff]  ;;  %v506_v16 = vld [vmem:[#allocation6 + $0x50] sm:$0xff] }
  0x1b   :  { %156 = vmatpush.bf16.msra.mxu0 %v502_v1  ;;  %v86_v14 = vpack.c.bf16 %v85_v13, %v84_v12  ;;  %v507_v15 = vld [vmem:[#allocation6 + $0x58] sm:$0xff]  ;;  %v505_v17 = vld [vmem:[#allocation6 + $0x48] sm:$0xff]  ;;  %v504_v18 = vld [vmem:[#allocation6 + $0x40] sm:$0xff] }
  0x1c   :  { %249 = vmatpush.bf16.msra.mxu1 %v510_v3  ;;  %v519_v19 = vld [vmem:[#allocation6 + $0xb8] sm:$0xff]  ;;  %v518_v20 = vld [vmem:[#allocation6 + $0xb0] sm:$0xff]  ;;  %v517_v21 = vld [vmem:[#allocation6 + $0xa8] sm:$0xff]  ;;  %v172_v26 = vstv %s171_s2 }
  0x1d   :  { %341 = vmatpush.bf16.msra.mxu2 %v519_v19  ;;  %v516_v22 = vld [vmem:[#allocation6 + $0xa0] sm:$0xff]  ;;  %v515_v34 = vld [vmem:[#allocation6 + $0x98] sm:$0xff]  ;;  %v514_v35 = vld [vmem:[#allocation6 + $0x90] sm:$0xff]  ;;  %v265_v41 = vstv %s462_s3 }
  0x1e   :  { %v531_v24 = vld [vmem:[#allocation8] ss:$0 sm:$0xff]  ;;  %v513_v36 = vld [vmem:[#allocation6 + $0x88] sm:$0xff]  ;;  %v532_v39 = vld [vmem:[#allocation8 + $0x1] ss:$0 sm:$0xff]  ;;  %v358_v51 = vstv %s495_s20 }
  0x1f   :  { %157 = vmatpush.bf16.msra.mxu0 %v501_v4  ;;  %v512_v37 = vld [vmem:[#allocation6 + $0x80] sm:$0xff]  ;;  %v534_v53 = vld [vmem:[%s729_s4] ss:$0 sm:$0xff]  ;;  %s383_s4 = sshll.u32 %s731_s6, 4  ;;  %s384_s4 = int_to_ptr.hbm [resolvable:$true] %s383_s4 }
  0x20   :  { %250 = vmatpush.bf16.msra.mxu1 %v509_v5  ;;  %v533_v49 = vld [vmem:[#allocation8 + $0x2] ss:$0 sm:$0xff]  ;;  %v535_v55 = vld [vmem:[%s730_s5] ss:$0 sm:$0xff] }
  0x21   :  { %342 = vmatpush.bf16.msra.mxu2 %v518_v20 }
  0x23   :  { %158 = vmatpush.bf16.msra.mxu0 %v500_v6 }
  0x24   :  { %251 = vmatpush.bf16.msra.mxu1 %v508_v7 }
  0x25   :  { %343 = vmatpush.bf16.msra.mxu2 %v517_v21 }
  0x27   :  { %159 = vmatpush.bf16.msra.mxu0 %v499_v8 }
  0x28   :  { %252 = vmatpush.bf16.msra.mxu1 %v507_v15 }
  0x29   :  { %344 = vmatpush.bf16.msra.mxu2 %v516_v22 }
  0x2b   :  { %160 = vmatpush.bf16.msra.mxu0 %v498_v9 }
  0x2c   :  { %253 = vmatpush.bf16.msra.mxu1 %v506_v16 }
  0x2d   :  { %345 = vmatpush.bf16.msra.mxu2 %v515_v34 }
  0x2f   :  { %161 = vmatpush.bf16.msra.mxu0 %v497_v10 }
  0x30   :  { %254 = vmatpush.bf16.msra.mxu1 %v505_v17 }
  0x31   :  { %346 = vmatpush.bf16.msra.mxu2 %v514_v35 }
  0x33   :  { %162 = vmatpush.bf16.msra.mxu0 %v496_v11 }
  0x34   :  { %255 = vmatpush.bf16.msra.mxu1 %v504_v18 }
  0x35   :  { %347 = vmatpush.bf16.msra.mxu2 %v513_v36 }
  0x36   :  { %163 = vmatmul.bf16.vlgmr.msra.gmra.mxu0 %v86_v14 }
  0x39   :  { %348 = vmatpush.bf16.msra.mxu2 %v512_v37 }
  0xb3   :  { %v164_v23 = vpop.f32.mrf.mxu0 }
  0xb4   :  { %v165_v25 = vadd.f32 %v531_v24, %v164_v23 }
  0xb6   :  { %v173_v28 = vmul.f32 %v172_v26, %v165_v25  ;;  %vm169_vm0 = vcmp.gt.f32.partialorder %v165_v25, 0.0 }
  0xb8   :  { %v175_v31 = vsel %vm169_vm0, %v165_v25, %v173_v28 }
  0xbb   :  { %v166_v27 = vpop.f32.mrf.mxu0 }
  0xbc   :  { %v167_v29 = vadd.f32 %v531_v24, %v166_v27 }
  0xbe   :  { %v174_v30 = vmul.f32 %v172_v26, %v167_v29  ;;  %vm170_vm1 = vcmp.gt.f32.partialorder %v167_v29, 0.0 }
  0xc0   :  { %v176_v32 = vsel %vm170_vm1, %v167_v29, %v174_v30 }
  0xc1   :  { %v177_v33 = vpack.c.bf16 %v176_v32, %v175_v31 }
  0xc3   :  { %256 = vmatmul.bf16.vlgmr.msra.gmra.mxu1 %v177_v33 }
 0x140   :  { %v257_v38 = vpop.f32.mrf.mxu1 }
 0x141   :  { %v258_v40 = vadd.f32 %v532_v39, %v257_v38 }
 0x143   :  { %v266_v43 = vmul.f32 %v265_v41, %v258_v40  ;;  %vm262_vm2 = vcmp.gt.f32.partialorder %v258_v40, 0.0 }
 0x145   :  { %v268_v46 = vsel %vm262_vm2, %v258_v40, %v266_v43 }
 0x148   :  { %v259_v42 = vpop.f32.mrf.mxu1 }
 0x149   :  { %v260_v44 = vadd.f32 %v532_v39, %v259_v42 }
 0x14b   :  { %v267_v45 = vmul.f32 %v265_v41, %v260_v44  ;;  %vm263_vm3 = vcmp.gt.f32.partialorder %v260_v44, 0.0 }
 0x14d   :  { %v269_v47 = vsel %vm263_vm3, %v260_v44, %v267_v45 }
 0x14e   :  { %v270_v48 = vpack.c.bf16 %v269_v47, %v268_v46 }
 0x150   :  { %349 = vmatmul.bf16.vlgmr.msra.gmra.mxu2 %v270_v48 }
 0x1d3   :  { %v350_v50 = vpop.f32.mrf.mxu2 }
 0x1d4   :  { %v351_v52 = vadd.f32 %v533_v49, %v350_v50 }
 0x1d6   :  { %vm355_vm4 = vcmp.gt.f32.partialorder %v351_v52, 0.0  ;;  %v359_v54 = vmul.f32 %v358_v51, %v351_v52 }
 0x1d8   :  { %v361_v56 = vsel %vm355_vm4, %v351_v52, %v359_v54 }
 0x1d9   :  { %v367_v57 = vmul.f32 %v534_v53, %v361_v56 }
 0x1db   :  { %v352_v58 = vpop.f32.mrf.mxu2  ;;  %v373_v59 = vadd.f32 %v535_v55, %v367_v57 }
 0x1dc   :  { %v353_v60 = vadd.f32 %v533_v49, %v352_v58 }
 0x1dd   :  { %375 = vst [vmem:[#allocation10] sm:$0xff] %v373_v59 }
 0x1de   :  { %vm356_vm5 = vcmp.gt.f32.partialorder %v353_v60, 0.0  ;;  %v360_v61 = vmul.f32 %v358_v51, %v353_v60 }
 0x1e0   :  { %v362_v62 = vsel %vm356_vm5, %v353_v60, %v360_v61 }
 0x1e1   :  { %v368_v63 = vmul.f32 %v534_v53, %v362_v62 }
 0x1e3   :  { %v374_v0 = vadd.f32 %v535_v55, %v368_v63 }
 0x1e5   :  { %376 = vst [vmem:[#allocation10 + $0x8] sm:$0xff] %v374_v0 }
 0x1e6   :  { %389 = dma.vmem_to_hbm [thread:$0]  %s382_s26, 256, %s384_s4, [#allocation4], %s656_s9, %s656_s9, %s657_s10  }
 0x1e7   :  { %650 = dma.done.wait [#allocation4], 256  }
 0x1e8   :  { %651 = vsyncadd [#allocation4], 4294967040 }
 0x1e9   :  { %394 = vsyncpa [#allocation3], 1 }
 0x1ea   :  { %395 = vsyncpa [#allocation7], 1 }
 0x1eb   :  { %396 = vsyncpa [#allocation4], 1 }
 0x1ec   :  { %397 = vsyncpa [#allocation5], 1 }

// kernel: tpu_custom_call.1
= control target key start
LH: loop header
LB: loop body
LE: loop exit
PB: predicated region body
PF: predicated region fallthrough
CT: control target
= control target key end

     0   :  { %11 = vsyncpa [#allocation3], 0  ;;  %s725_s0 = inlined_call_operand.hbm [shape: f32[16,128], index: 0, kind: input, shape index: {}]   ;;  %s726_s1 = inlined_call_operand.hbm [shape: bf16[3,128,128], index: 1, kind: input, shape index: {}]   ;;  %s727_s2 = inlined_call_operand.hbm [shape: f32[3,1,128], index: 2, kind: input, shape index: {}]   ;;  %s728_s3 = inlined_call_operand.vmem [shape: f32[3], index: 3, kind: input, shape index: {}]   ;;  %s729_s4 = inlined_call_operand.vmem [shape: f32[1,128], index: 4, kind: input, shape index: {}]   ;;  %s730_s5 = inlined_call_operand.vmem [shape: f32[1,128], index: 5, kind: input, shape index: {}]   ;;  %s731_s6 = inlined_call_operand.hbm [shape: f32[16,128], index: 6, kind: output, shape index: {}]  }
   0x1   :  { %12 = vsyncpa [#allocation7], 0 }
   0x2   :  { %13 = vsyncpa [#allocation5], 0  ;;  %s32_s23 = sshll.u32 %s726_s1, 4  ;;  %s33_s23 = int_to_ptr.hbm [resolvable:$true] %s32_s23 }
   0x3   :  { %14 = vsyncpa [#allocation4], 0  ;;  %s652_s24 = smov [#allocation6]   ;;  %s19_s28 = sshll.u32 %s725_s0, 4  ;;  %s20_s28 = int_to_ptr.hbm [resolvable:$true] %s19_s28 }
   0x4   :  { %s34_s25 = sshll.u32 %s652_s24, 4  ;;  %s653_s29 = smov 64   ;;  %s35_s25 = int_to_ptr.vmem [resolvable:$true] %s34_s25 }
   0x5   :  { %s654_s30 = smov 4   ;;  %s655_s7 = smov [#allocation2]  }
   0x6   :  { %40 = dma.hbm_to_vmem [thread:$0]  %s33_s23, 3072, %s35_s25, [#allocation7], %s653_s29, %s653_s29, %s654_s30  }
   0x7   :  { %s21_s8 = sshll.u32 %s655_s7, 4  ;;  %s656_s9 = smov 128   ;;  %s22_s8 = int_to_ptr.vmem [resolvable:$true] %s21_s8 }
   0x8   :  { %s657_s10 = smov 8   ;;  %s45_s12 = sshll.u32 %s727_s2, 4  ;;  %s46_s12 = int_to_ptr.hbm [resolvable:$true] %s45_s12 }
   0x9   :  { %27 = dma.hbm_to_vmem [thread:$0]  %s20_s28, 256, %s22_s8, [#allocation3], %s656_s9, %s656_s9, %s657_s10  }
   0xa   :  { %s658_s13 = smov [#allocation8]   ;;  %s59_s16 = sshll.u32 %s728_s3, 4  ;;  %s60_s16 = int_to_ptr.vmem [resolvable:$true] %s59_s16 }
   0xb   :  { %s47_s0 = sshll.u32 %s658_s13, 4  ;;  %s659_s17 = smov 16   ;;  %s48_s0 = int_to_ptr.vmem [resolvable:$true] %s47_s0 }
   0xc   :  { %s660_s18 = smov 1   ;;  %s661_s19 = smov [#allocation9]  }
   0xd   :  { %53 = dma.hbm_to_vmem [thread:$0]  %s46_s12, 48, %s48_s0, [#allocation7], %s659_s17, %s659_s17, %s660_s18  }
   0xe   :  { %62 = dma.vmem_to_smem %s60_s16, 16, %s661_s19, [#allocation5]  }
   0xf   :  { %644 = dma.done.wait [#allocation3], 256  }
  0x10   :  { %645 = vsyncadd [#allocation3], 4294967040 }
  0x11   :  { %646 = dma.done.wait [#allocation7], 3120  }
  0x12   :  { %647 = vsyncadd [#allocation7], 4294964176 }
  0x13   :  { %648 = dma.done.wait [#allocation5], 16  }
  0x14   :  { %649 = vsyncadd [#allocation5], 4294967280 }
  0x15   :  { %83 = sfence }
  0x16   :  { %v503_v0 = vld [vmem:[#allocation6 + $0x38] sm:$0xff]  ;;  %v502_v1 = vld [vmem:[#allocation6 + $0x30] sm:$0xff]  ;;  %v501_v4 = vld [vmem:[#allocation6 + $0x28] sm:$0xff]  ;;  %s171_s2 = sld [smem:[#allocation9]]  ;;  %s662_s25 = smov [#allocation10]  }
  0x17   :  { %155 = vmatpush.bf16.msra.mxu0 %v503_v0  ;;  %v511_v2 = vld [vmem:[#allocation6 + $0x78] sm:$0xff]  ;;  %v510_v3 = vld [vmem:[#allocation6 + $0x70] sm:$0xff]  ;;  %v509_v5 = vld [vmem:[#allocation6 + $0x68] sm:$0xff]  ;;  %s462_s3 = sld [smem:[#allocation9 + $0x1]]  ;;  %s381_s26 = sshll.u32 %s662_s25, 4  ;;  %s382_s26 = int_to_ptr.vmem [resolvable:$true] %s381_s26 }
  0x18   :  { %248 = vmatpush.bf16.msra.mxu1 %v511_v2  ;;  %v500_v6 = vld [vmem:[#allocation6 + $0x20] sm:$0xff]  ;;  %v499_v8 = vld [vmem:[#allocation6 + $0x18] sm:$0xff]  ;;  %v498_v9 = vld [vmem:[#allocation6 + $0x10] sm:$0xff]  ;;  %s495_s20 = sld [smem:[#allocation9 + $0x2]] }
  0x19   :  { %v508_v7 = vld [vmem:[#allocation6 + $0x60] sm:$0xff]  ;;  %v497_v10 = vld [vmem:[#allocation6 + $0x8] sm:$0xff]  ;;  %v84_v12 = vld [vmem:[#allocation2] sm:$0xff] }
  0x1a   :  { %v496_v11 = vld [vmem:[#allocation6] sm:$0xff]  ;;  %v85_v13 = vld [vmem:[#allocation2 + $0x8] sm:$0xff]  ;;  %v506_v16 = vld [vmem:[#allocation6 + $0x50] sm:$0xff] }
  0x1b   :  { %156 = vmatpush.bf16.msra.mxu0 %v502_v1  ;;  %v86_v14 = vpack.c.bf16 %v85_v13, %v84_v12  ;;  %v507_v15 = vld [vmem:[#allocation6 + $0x58] sm:$0xff]  ;;  %v505_v17 = vld [vmem:[#allocation6 + $0x48] sm:$0xff]  ;;  %v504_v18 = vld [vmem:[#allocation6 + $0x40] sm:$0xff] }
  0x1c   :  { %249 = vmatpush.bf16.msra.mxu1 %v510_v3  ;;  %v519_v19 = vld [vmem:[#allocation6 + $0xb8] sm:$0xff]  ;;  %v518_v20 = vld [vmem:[#allocation6 + $0xb0] sm:$0xff]  ;;  %v517_v21 = vld [vmem:[#allocation6 + $0xa8] sm:$0xff]  ;;  %v172_v26 = vstv %s171_s2 }
  0x1d   :  { %341 = vmatpush.bf16.msra.mxu2 %v519_v19  ;;  %v516_v22 = vld [vmem:[#allocation6 + $0xa0] sm:$0xff]  ;;  %v515_v34 = vld [vmem:[#allocation6 + $0x98] sm:$0xff]  ;;  %v514_v35 = vld [vmem:[#allocation6 + $0x90] sm:$0xff]  ;;  %v265_v41 = vstv %s462_s3 }
  0x1e   :  { %v531_v24 = vld [vmem:[#allocation8] ss:$0 sm:$0xff]  ;;  %v513_v36 = vld [vmem:[#allocation6 + $0x88] sm:$0xff]  ;;  %v532_v39 = vld [vmem:[#allocation8 + $0x1] ss:$0 sm:$0xff]  ;;  %v358_v51 = vstv %s495_s20 }
  0x1f   :  { %157 = vmatpush.bf16.msra.mxu0 %v501_v4  ;;  %v512_v37 = vld [vmem:[#allocation6 + $0x80] sm:$0xff]  ;;  %v534_v53 = vld [vmem:[%s729_s4] ss:$0 sm:$0xff]  ;;  %s383_s4 = sshll.u32 %s731_s6, 4  ;;  %s384_s4 = int_to_ptr.hbm [resolvable:$true] %s383_s4 }
  0x20   :  { %250 = vmatpush.bf16.msra.mxu1 %v509_v5  ;;  %v533_v49 = vld [vmem:[#allocation8 + $0x2] ss:$0 sm:$0xff]  ;;  %v535_v55 = vld [vmem:[%s730_s5] ss:$0 sm:$0xff] }
  0x21   :  { %342 = vmatpush.bf16.msra.mxu2 %v518_v20 }
  0x23   :  { %158 = vmatpush.bf16.msra.mxu0 %v500_v6 }
  0x24   :  { %251 = vmatpush.bf16.msra.mxu1 %v508_v7 }
  0x25   :  { %343 = vmatpush.bf16.msra.mxu2 %v517_v21 }
  0x27   :  { %159 = vmatpush.bf16.msra.mxu0 %v499_v8 }
  0x28   :  { %252 = vmatpush.bf16.msra.mxu1 %v507_v15 }
  0x29   :  { %344 = vmatpush.bf16.msra.mxu2 %v516_v22 }
  0x2b   :  { %160 = vmatpush.bf16.msra.mxu0 %v498_v9 }
  0x2c   :  { %253 = vmatpush.bf16.msra.mxu1 %v506_v16 }
  0x2d   :  { %345 = vmatpush.bf16.msra.mxu2 %v515_v34 }
  0x2f   :  { %161 = vmatpush.bf16.msra.mxu0 %v497_v10 }
  0x30   :  { %254 = vmatpush.bf16.msra.mxu1 %v505_v17 }
  0x31   :  { %346 = vmatpush.bf16.msra.mxu2 %v514_v35 }
  0x33   :  { %162 = vmatpush.bf16.msra.mxu0 %v496_v11 }
  0x34   :  { %255 = vmatpush.bf16.msra.mxu1 %v504_v18 }
  0x35   :  { %347 = vmatpush.bf16.msra.mxu2 %v513_v36 }
  0x36   :  { %163 = vmatmul.bf16.vlgmr.msra.gmra.mxu0 %v86_v14 }
  0x39   :  { %348 = vmatpush.bf16.msra.mxu2 %v512_v37 }
  0xb3   :  { %v164_v23 = vpop.f32.mrf.mxu0 }
  0xb4   :  { %v165_v25 = vadd.f32 %v531_v24, %v164_v23 }
  0xb6   :  { %v173_v28 = vmul.f32 %v172_v26, %v165_v25  ;;  %vm169_vm0 = vcmp.gt.f32.partialorder %v165_v25, 0.0 }
  0xb8   :  { %v175_v31 = vsel %vm169_vm0, %v165_v25, %v173_v28 }
  0xbb   :  { %v166_v27 = vpop.f32.mrf.mxu0 }
  0xbc   :  { %v167_v29 = vadd.f32 %v531_v24, %v166_v27 }
  0xbe   :  { %v174_v30 = vmul.f32 %v172_v26, %v167_v29  ;;  %vm170_vm1 = vcmp.gt.f32.partialorder %v167_v29, 0.0 }
  0xc0   :  { %v176_v32 = vsel %vm170_vm1, %v167_v29, %v174_v30 }
  0xc1   :  { %v177_v33 = vpack.c.bf16 %v176_v32, %v175_v31 }
  0xc3   :  { %256 = vmatmul.bf16.vlgmr.msra.gmra.mxu1 %v177_v33 }
 0x140   :  { %v257_v38 = vpop.f32.mrf.mxu1 }
 0x141   :  { %v258_v40 = vadd.f32 %v532_v39, %v257_v38 }
 0x143   :  { %v266_v43 = vmul.f32 %v265_v41, %v258_v40  ;;  %vm262_vm2 = vcmp.gt.f32.partialorder %v258_v40, 0.0 }
 0x145   :  { %v268_v46 = vsel %vm262_vm2, %v258_v40, %v266_v43 }
 0x148   :  { %v259_v42 = vpop.f32.mrf.mxu1 }
 0x149   :  { %v260_v44 = vadd.f32 %v532_v39, %v259_v42 }
 0x14b   :  { %v267_v45 = vmul.f32 %v265_v41, %v260_v44  ;;  %vm263_vm3 = vcmp.gt.f32.partialorder %v260_v44, 0.0 }
 0x14d   :  { %v269_v47 = vsel %vm263_vm3, %v260_v44, %v267_v45 }
 0x14e   :  { %v270_v48 = vpack.c.bf16 %v269_v47, %v268_v46 }
 0x150   :  { %349 = vmatmul.bf16.vlgmr.msra.gmra.mxu2 %v270_v48 }
 0x1d3   :  { %v350_v50 = vpop.f32.mrf.mxu2 }
 0x1d4   :  { %v351_v52 = vadd.f32 %v533_v49, %v350_v50 }
 0x1d6   :  { %vm355_vm4 = vcmp.gt.f32.partialorder %v351_v52, 0.0  ;;  %v359_v54 = vmul.f32 %v358_v51, %v351_v52 }
 0x1d8   :  { %v361_v56 = vsel %vm355_vm4, %v351_v52, %v359_v54 }
 0x1d9   :  { %v367_v57 = vmul.f32 %v534_v53, %v361_v56 }
 0x1db   :  { %v352_v58 = vpop.f32.mrf.mxu2  ;;  %v373_v59 = vadd.f32 %v535_v55, %v367_v57 }
 0x1dc   :  { %v353_v60 = vadd.f32 %v533_v49, %v352_v58 }
 0x1dd   :  { %375 = vst [vmem:[#allocation10] sm:$0xff] %v373_v59 }
 0x1de   :  { %vm356_vm5 = vcmp.gt.f32.partialorder %v353_v60, 0.0  ;;  %v360_v61 = vmul.f32 %v358_v51, %v353_v60 }
 0x1e0   :  { %v362_v62 = vsel %vm356_vm5, %v353_v60, %v360_v61 }
 0x1e1   :  { %v368_v63 = vmul.f32 %v534_v53, %v362_v62 }
 0x1e3   :  { %v374_v0 = vadd.f32 %v535_v55, %v368_v63 }
 0x1e5   :  { %376 = vst [vmem:[#allocation10 + $0x8] sm:$0xff] %v374_v0 }
 0x1e6   :  { %389 = dma.vmem_to_hbm [thread:$0]  %s382_s26, 256, %s384_s4, [#allocation4], %s656_s9, %s656_s9, %s657_s10  }
 0x1e7   :  { %650 = dma.done.wait [#allocation4], 256  }
 0x1e8   :  { %651 = vsyncadd [#allocation4], 4294967040 }
 0x1e9   :  { %394 = vsyncpa [#allocation3], 1 }
 0x1ea   :  { %395 = vsyncpa [#allocation7], 1 }
 0x1eb   :  { %396 = vsyncpa [#allocation4], 1 }
 0x1ec   :  { %397 = vsyncpa [#allocation5], 1 }

</bundles_post_ra>
